<compile_context>
chip_gen: v5e
topology: v5e:2x2
jax: 0.10.0
libtpu: 0.0.40
codegen_flags: <defaults>
</compile_context>

<pallas_src>
import jax
import jax.numpy as jnp
from jax.experimental import pallas as pl
from jax.experimental.pallas import tpu as pltpu


# Don't split a single-step grid into two steps if it would push tiles below
# this size (per-grid-step overhead ~0.35 us dominates for tiny tiles).
_MIN_SPLIT_TILE_BYTES = 256 * 1024


def _vmem_budget():
    """(vmem_limit_bytes, per_tile_budget_bytes) for the current chip.

    Input + output tiles are each double-buffered (~4x tile resident) plus
    weights, so the per-tile budget is ~1/6 of the scoped limit."""
    try:
        vmem_cap = pltpu.get_tpu_info().vmem_capacity_bytes
    except Exception:
        vmem_cap = 64 * 1024 * 1024          # conservative: v7x per-TC VMEM
    vmem_limit = (vmem_cap * 3) // 4         # 96 MiB on v5e/v6e, 48 MiB on v7x
    tile_budget = vmem_limit // 6
    return vmem_limit, tile_budget


def _choose_batch_tile(batch, per_image_bytes, tile_budget_bytes):
    """Largest batch tile that fits the VMEM budget.

    Only split to >=2 grid steps (so dimension_semantics=('parallel',) can
    feed both v7x TensorCores and the pipeline overlaps DMA) when the split
    tiles stay above the per-step-overhead floor."""
    cap = max(1, tile_budget_bytes // max(1, per_image_bytes))
    bt = min(batch, cap)
    if bt >= batch and batch > 1:
        half = (batch + 1) // 2
        if half * per_image_bytes >= _MIN_SPLIT_TILE_BYTES:
            bt = half
    if bt >= 8:                 # sublane-friendly M for the tiny FC matmuls
        bt -= bt % 8
    return max(1, bt)


def se_kernel(x_ref, w1t_ref, w2t_ref, o_ref):
    # x_ref / o_ref: (Btile, C, HW)  -- HW on the lane axis (lane-dense when
    # HW % 128 == 0; otherwise the full-extent last dim is still correct,
    # just padded).  w1t_ref: (C, hidden) f32; w2t_ref: (hidden, C) f32.
    inv_hw = 1.0 / x_ref.shape[-1]

    # Squeeze: global average pool over the lane axis, fp32 accumulation.
    # This read's live range ends here (no whole-tile temp across the FCs).
    pooled = jnp.sum(x_ref[...], axis=-1, dtype=jnp.float32) * inv_hw   # (Bt, C)

    # Excitation: Linear -> ReLU -> Linear -> Sigmoid (tiny, on the MXU).
    h = jnp.dot(pooled, w1t_ref[...], preferred_element_type=jnp.float32)
    h = jnp.maximum(h, 0.0)                                             # (Bt, hid)
    y = jnp.dot(h, w2t_ref[...], preferred_element_type=jnp.float32)    # (Bt, C)
    y = jax.nn.sigmoid(y)

    # Scale: per-channel lane-broadcast over HW.  Second read of x keeps the
    # rescale a clean load-mul-store stream in the input dtype; only the tiny
    # (Bt, C, 1) scale is cast.
    scale = y[:, :, None].astype(o_ref.dtype)
    o_ref[...] = (x_ref[...] * scale).astype(o_ref.dtype)


def se_module(x, w1, w2):
    """SEModule forward.
    x: (B, C, H, W).  w1: (hidden, C), w2: (C, hidden) -- PyTorch nn.Linear
    weight layout (out_features, in_features), no bias."""
    B, C, H, W = x.shape
    hidden = w1.shape[0]
    HW = H * W

    # Lane-dense view of the activations.
    # TODO(synk): for SE layers where HW is not a multiple of 128 but C is
    # (e.g. 7x7 / 14x14 spatial with C in {128..2048}), a channels-last
    # (B, HW, C) block layout avoids lane padding / masked stores -- only
    # worth it if the surrounding graph is already channels-last.
    x2 = x.reshape(B, C, HW)

    # Pre-transpose AND pre-cast the tiny FC weights once in the wrapper
    # (avoids a per-grid-step astype and multi-pass f32 MXU input handling).
    w1t = jnp.transpose(w1).astype(jnp.float32)    # (C, hidden)
    w2t = jnp.transpose(w2).astype(jnp.float32)    # (hidden, C)

    vmem_limit, tile_budget = _vmem_budget()
    itemsize = jnp.dtype(x.dtype).itemsize
    per_image_bytes = C * HW * itemsize
    # TODO(synk): if one image exceeds the per-tile VMEM budget (huge
    # early-layer activations, especially on v7x's 64 MiB VMEM), switch to a
    # two-pass kernel (HW-chunked pool with an 'arbitrary' reduction axis,
    # then a rescale pass re-reading x).
    bt = _choose_batch_tile(B, per_image_bytes, tile_budget)

    # Pad the batch to a multiple of the tile instead of shrinking the tile
    # toward 1 for awkward (e.g. prime) batch sizes.  Zero-padded rows are
    # self-contained (their pooled value only affects their own dropped rows).
    grid_steps = pl.cdiv(B, bt)
    b_pad = grid_steps * bt
    if b_pad != B:
        x2 = jnp.pad(x2, ((0, b_pad - B), (0, 0), (0, 0)))

    # Bandwidth-bound cost hint: read x once, write once, tiny FC.
    bytes_accessed = 2 * B * C * HW * itemsize \
        + (w1t.size + w2t.size) * 4
    flops = 4 * B * C * hidden + 2 * B * C * HW   # FCs + pool + rescale
    cost = pl.CostEstimate(flops=flops,
                           transcendentals=B * C,      # sigmoid
                           bytes_accessed=bytes_accessed)

    out2 = pl.pallas_call(
        se_kernel,
        out_shape=jax.ShapeDtypeStruct((b_pad, C, HW), x.dtype),
        grid=(grid_steps,),
        in_specs=[
            pl.BlockSpec((bt, C, HW), lambda b: (b, 0, 0)),
            pl.BlockSpec((C, hidden), lambda b: (0, 0)),   # resident weights
            pl.BlockSpec((hidden, C), lambda b: (0, 0)),
        ],
        out_specs=pl.BlockSpec((bt, C, HW), lambda b: (b, 0, 0)),
        compiler_params=pltpu.CompilerParams(
            dimension_semantics=("parallel",),
            vmem_limit_bytes=vmem_limit),
        cost_estimate=cost,
    )(x2, w1t, w2t)

    if b_pad != B:
        out2 = out2[:B]
    return out2.reshape(B, C, H, W)


def se_module_ref(x, w1, w2):
    """Pure-JAX reference matching the PyTorch forward."""
    y = jnp.mean(x, axis=(2, 3))              # (b, c)
    y = jnp.maximum(y @ w1.T, 0.0)            # (b, hidden)
    y = jax.nn.sigmoid(y @ w2.T)              # (b, c)
    return x * y[:, :, None, None]


if __name__ == "__main__":
    # Small shapes consistent with the module: channel divisible by reduction.
    B, C, H, W = 8, 64, 16, 16
    reduction = 16
    hidden = C // reduction   # 4

    key = jax.random.PRNGKey(0)
    kx, k1, k2 = jax.random.split(key, 3)
    x = jax.random.normal(kx, (B, C, H, W), dtype=jnp.float32)
    # Deterministic synthetic weights (nn.Linear layout: (out, in), no bias).
    w1 = jax.random.normal(k1, (hidden, C), dtype=jnp.float32) * 0.1
    w2 = jax.random.normal(k2, (C, hidden), dtype=jnp.float32) * 0.1

    out = se_module(x, w1, w2)
    out = jax.block_until_ready(out)

    ref = se_module_ref(x, w1, w2)
    assert jnp.allclose(out, ref, atol=1e-5, rtol=1e-5), "mismatch vs reference"

    print("KERNEL_OK")
</pallas_src>

<mosaic_0001>
module attributes {stable_mosaic.version = 11 : i64} {
  func.func @se_kernel(%arg0: i32, %arg1: memref<4x64x256xf32, #tpu.memory_space<vmem>>, %arg2: memref<64x4xf32, #tpu.memory_space<vmem>>, %arg3: memref<4x64xf32, #tpu.memory_space<vmem>>, %arg4: memref<4x64x256xf32, #tpu.memory_space<vmem>>) attributes {dimension_semantics = [#tpu.dimension_semantics<parallel>], iteration_bounds = array<i64: 2>, scalar_prefetch = 0 : i64, scratch_operands = 0 : i64, tpu.core_type = #tpu.core_type<tc>, window_params = [{transform_indices = @transform_0, window_bounds = array<i64: 4, 64, 256>}, {pipeline_mode = #tpu.pipeline_mode<synchronous>, transform_indices = @transform_1, window_bounds = array<i64: 64, 4>}, {pipeline_mode = #tpu.pipeline_mode<synchronous>, transform_indices = @transform_2, window_bounds = array<i64: 4, 64>}, {transform_indices = @transform_3, window_bounds = array<i64: 4, 64, 256>}]} {
    %c0 = arith.constant 0 : index
    %c0_0 = arith.constant 0 : index
    %c0_1 = arith.constant 0 : index
    %0 = vector.load %arg1[%c0, %c0_0, %c0_1] : memref<4x64x256xf32, #tpu.memory_space<vmem>>, vector<4x64x256xf32>
    %cst = arith.constant dense<0.000000e+00> : vector<4x64xf32>
    %1 = vector.multi_reduction <add>, %0, %cst [2] : vector<4x64x256xf32> to vector<4x64xf32>
    %cst_2 = arith.constant 3.906250e-03 : f32
    %2 = vector.broadcast %cst_2 : f32 to vector<4x64xf32>
    %3 = arith.mulf %1, %2 : vector<4x64xf32>
    %c0_3 = arith.constant 0 : index
    %c0_4 = arith.constant 0 : index
    %4 = vector.load %arg2[%c0_3, %c0_4] : memref<64x4xf32, #tpu.memory_space<vmem>>, vector<64x4xf32>
    %cst_5 = arith.constant dense<0.000000e+00> : vector<4x4xf32>
    %5 = tpu.matmul %3, %4, %cst_5 {dimension_numbers = #tpu.dot_dimension_numbers<[1], [0], [0], [1], [0, 0, 1, 1], [], []>} : vector<4x64xf32>, vector<64x4xf32>, vector<4x4xf32> -> vector<4x4xf32>
    %cst_6 = arith.constant 0.000000e+00 : f32
    %6 = vector.broadcast %cst_6 : f32 to vector<4x4xf32>
    %7 = arith.maximumf %5, %6 : vector<4x4xf32>
    %c0_7 = arith.constant 0 : index
    %c0_8 = arith.constant 0 : index
    %8 = vector.load %arg3[%c0_7, %c0_8] : memref<4x64xf32, #tpu.memory_space<vmem>>, vector<4x64xf32>
    %cst_9 = arith.constant dense<0.000000e+00> : vector<4x64xf32>
    %9 = tpu.matmul %7, %8, %cst_9 {dimension_numbers = #tpu.dot_dimension_numbers<[1], [0], [0], [1], [0, 0, 1, 1], [], []>} : vector<4x4xf32>, vector<4x64xf32>, vector<4x64xf32> -> vector<4x64xf32>
    %10 = arith.negf %9 : vector<4x64xf32>
    %11 = math.exp %10 : vector<4x64xf32>
    %cst_10 = arith.constant 1.000000e+00 : f32
    %12 = vector.broadcast %cst_10 : f32 to vector<4x64xf32>
    %13 = arith.addf %12, %11 : vector<4x64xf32>
    %14 = arith.divf %12, %13 : vector<4x64xf32>
    %15 = vector.shape_cast %14 : vector<4x64xf32> to vector<4x64x1xf32>
    %c0_11 = arith.constant 0 : index
    %c0_12 = arith.constant 0 : index
    %c0_13 = arith.constant 0 : index
    %16 = vector.load %arg1[%c0_11, %c0_12, %c0_13] : memref<4x64x256xf32, #tpu.memory_space<vmem>>, vector<4x64x256xf32>
    %17 = vector.broadcast %15 : vector<4x64x1xf32> to vector<4x64x256xf32>
    %18 = arith.mulf %16, %17 : vector<4x64x256xf32>
    %c0_14 = arith.constant 0 : index
    %c0_15 = arith.constant 0 : index
    %c0_16 = arith.constant 0 : index
    %19 = vector.load %arg4[%c0_14, %c0_15, %c0_16] : memref<4x64x256xf32, #tpu.memory_space<vmem>>, vector<4x64x256xf32>
    tpu.vector_store %arg4[%c0_14, %c0_15, %c0_16], %18 {strides = array<i32>} : memref<4x64x256xf32, #tpu.memory_space<vmem>>, vector<4x64x256xf32>,
    return
  }
  func.func @transform_0(%arg0: i32) -> (i32, i32, i32) {
    %c0_i32 = arith.constant 0 : i32
    %c0_i32_0 = arith.constant 0 : i32
    %c0_i32_1 = arith.constant 0 : i32
    return %arg0, %c0_i32, %c0_i32_0 : i32, i32, i32
  }
  func.func @transform_1(%arg0: i32) -> (i32, i32) {
    %c0_i32 = arith.constant 0 : i32
    %c0_i32_0 = arith.constant 0 : i32
    %c0_i32_1 = arith.constant 0 : i32
    return %c0_i32, %c0_i32_0 : i32, i32
  }
  func.func @transform_2(%arg0: i32) -> (i32, i32) {
    %c0_i32 = arith.constant 0 : i32
    %c0_i32_0 = arith.constant 0 : i32
    %c0_i32_1 = arith.constant 0 : i32
    return %c0_i32, %c0_i32_0 : i32, i32
  }
  func.func @transform_3(%arg0: i32) -> (i32, i32, i32) {
    %c0_i32 = arith.constant 0 : i32
    %c0_i32_0 = arith.constant 0 : i32
    %c0_i32_1 = arith.constant 0 : i32
    return %arg0, %c0_i32, %c0_i32_0 : i32, i32, i32
  }
}

</mosaic_0001>

<bundles_post_ra>
// kernel: tpu_custom_call.1
= control target key start
LH: loop header
LB: loop body
LE: loop exit
PB: predicated region body
PF: predicated region fallthrough
CT: control target
= control target key end

     0   :  { %8 = vsyncpa [#allocation3], 0  ;;  %s1956_s0 = inlined_call_operand.hbm [shape: f32[8,64,256], index: 0, kind: input, shape index: {}]   ;;  %s1957_s1 = inlined_call_operand.vmem [shape: f32[64,4], index: 1, kind: input, shape index: {}]   ;;  %s1958_s2 = inlined_call_operand.vmem [shape: f32[4,64], index: 2, kind: input, shape index: {}]   ;;  %s1959_s3 = inlined_call_operand.hbm [shape: f32[8,64,256], index: 3, kind: output, shape index: {}]  }
   0x1   :  { %10 = vsyncpa [#allocation3 + $0x1], 0 }
   0x2   :  { %11 = vsyncpa [#allocation4], 0 }
   0x3   :  { %13 = vsyncpa [#allocation4 + $0x1], 0  ;;  %s1227_s12 = smov 0   ;;  %s1229_s13 = smov 0  }
   0x4   :  { %s1231_s14 = smov 0   ;;  %s1233_s15 = smov 0  }
   0x5 LB: > { %s1248_s16 = sadd.s32 4294967295, %s1201_s15   ;;  %s994_s17 = sadd.s32 4294967294, %s1201_s15   ;;  %s1201_s15 = sphi %s1233_s15, %s2094_s15   ;;  %s1197_s14 = sphi %s1231_s14, %s2093_s14   ;;  %s1193_s13 = sphi %s1229_s13, %s2092_s13   ;;  %s1189_s12 = sphi %s1227_s12, %s2091_s12  }
   0x6   : > { %s1252_s18 = sadd.s32 1, %s1201_s15   ;;  %s26_s19 = sadd.s32 1, %s1197_s14 }
   0x7   : > { %s23_s20 = ssub.s32 %s1201_s15, %s1252_s18  ;;  %p33_p0 = scmp.ne.s32.totalorder %s1197_s14, %s1193_s13 }
   0x8   : > { %p24_p1 = scmp.eq.s32.totalorder %s23_s20, 0  ;;  %p34_p2 = scmp.eq.s32.totalorder %s1201_s15, 0 }
   0x9   : > { %p39_p3 = scmp.ne.s32.totalorder %s1193_s13, %s1189_s12  ;;  %p40_p4 = scmp.eq.s32.totalorder %s1248_s16, 0 }
   0xa   : > { %s1264_s21 = scalar_select %p24_p1, %s1197_s14, %s26_s19  }
   0xb   : > { %p1266_p5 = por %p34_p2, %p33_p0  ;;  %p1270_p6 = por %p40_p4, %p39_p3 }
   0xc   : > { %p105_p7 = scmp.eq.s32.totalorder %s1248_s16, 1  ;;  %p111_p8 = scmp.eq.s32.totalorder %s994_s17, 1 }
   0xd   : > { %p1030_p10 = scmp.lt.s32.totalorder %s1201_s15, 2  ;;  %s137_s26 = sand.u32 1, %s1197_s14  }
   0xe   : > { %p1277_p11 = por %p105_p7, %p33_p0  ;;  %p1281_p12 = por %p111_p8, %p39_p3 }
   0xf   : > { %s1015_s27 = sshll.u32 %s1201_s15, 9  ;;  %s997_s28 = sshll.u32 %s137_s26, 9 }
  0x10   : > { %s147_s4 = scalar_lea.hbm %s1956_s0, %s1015_s27  ;;  %s141_s6 = scalar_lea.vmem [#allocation2], %s997_s28 }
  0x11   : > { %s148_s5 = sshll.u32 %s147_s4, 4  ;;  %s150_s7 = sshll.u32 %s141_s6, 4  ;;  %s149_s5 = int_to_ptr.hbm [resolvable:$true] %s148_s5  ;;  %s151_s7 = int_to_ptr.vmem [resolvable:$true] %s150_s7 }
  0x12   : > { %p1292_p13 = pnand %p1030_p10, %p1266_p5  ;;  %p1001_p0 = scmp.ge.s32.totalorder %s1201_s15, 1 }
  0x13   : > { %p158_p1 = scmp.lt.s32.totalorder %s1201_s15, 3  ;;  %s138_s9 = scalar_lea.sflag [#allocation3], %s137_s26 }
  0x14   : > { %s1105_s10 = sshra.s32 %s149_s5, 4  ;;  %p1109_p3 = pneg %p1292_p13  ;;  %s1106_s10 = int_to_ptr.hbm [resolvable:$true] %s1105_s10 }
  0x15   : > { %s1107_s11 = scalar_lea.hbm %s1106_s10, 512  ;;  %s1112_s20 = scalar_lea.hbm %s1956_s0, 1024 }
  0x16   : > { %p1108_p2 = scmp.ne.s32.totalorder %s1106_s10, %s1107_s11  ;;  %p1113_p5 = scmp.lt.s32.totalorder %s1106_s10, %s1956_s0 }
  0x17   : > { %p1114_p8 = scmp.lt.s32.totalorder %s1112_s20, %s1107_s11 }
  0x18   : > { %p1110_p4 = pnand %p1109_p3, %p1108_p2 }
  0x19   : > { %p1115_p10 = por %p1114_p8, %p1113_p5 }
  0x1a   : > { %p1111_p7 = pneg %p1110_p4 }
  0x1c   : > { %p1116_p9 = pnand %p1115_p10, %p1111_p7 }
  0x1e   : > { %1119 = shalt.err (!%p1116_p9)
}
  0x1f   : > { %s1203_s26 = smov 256   ;;  %s1204_s28 = smov 16  }
  0x20   : > { %1025 = dma.hbm_to_vmem [thread:$0]  (!%p1292_p13), %s149_s5, 8192, %s151_s7, %s138_s9, %s1203_s26, %s1203_s26, %s1204_s28  }
  0x21   : > { %p159_p2 = pnand %p1001_p0, %p158_p1 }
  0x23   : > { %162 = sbr.rel (%p159_p2) target bundleno = 843 (0x34b), region = 32 }
  0x28   : > { %s1313_s29 = sand.u32 1, %s1193_s13  }
  0x29   : > { %s1002_s30 = sshll.u32 %s1313_s29, 9  ;;  %s165_s4 = scalar_lea.sflag [#allocation3], %s1313_s29 }
  0x2a   : > { %s1319_s6 = scalar_lea.vmem [#allocation2], %s1002_s30 }
  0x2b   : > { %1180 = dma.done.wait (%p1270_p6), %s165_s4, 8192  }
  0x2c   : > { %1182 = vsyncadd (%p1270_p6), %s165_s4, 4294959104  ;;  %v1326_v0 = vld [vmem:[%s1319_s6 + $0x80] sm:$0xff]  ;;  %v1329_v1 = vld [vmem:[%s1319_s6 + $0x88] sm:$0xff]  ;;  %vm431_vm0 = vcmask 130112   ;;  %vm435_vm1 = vcmask 195712   ;;  %vm439_vm2 = vcmask 261312  }
  0x2d   : > { %v1332_v2 = vld [vmem:[%s1319_s6 + $0x20] sm:$0xff]  ;;  %v282_v3 = vadd.f32 %v1329_v1, %v1326_v0  ;;  %v1337_v4 = vld [vmem:[%s1319_s6 + $0x28] sm:$0xff]  ;;  %v1350_v9 = vld [vmem:[%s1319_s6 + $0x90] sm:$0xff]  ;;  %vm443_vm3 = vcmask 326912   ;;  %vm447_vm4 = vcmask 392512   ;;  %vm451_vm5 = vcmask 458112  }
  0x2e   : > { %v1340_v5 = vld [vmem:[%s1319_s6] sm:$0xff]  ;;  %v1343_v6 = vld [vmem:[%s1319_s6 + $0x8] sm:$0xff]  ;;  %v264_v7 = vadd.f32 %v1337_v4, %v1332_v2  ;;  %v1353_v10 = vld [vmem:[%s1319_s6 + $0x98] sm:$0xff]  ;;  %vm455_vm6 = vcmask 523712   ;;  %vm502_vm7 = vcmask 1041409   ;;  %vm504_vm8 = vcmask 1042434  }
  0x2f   : > { %v258_v8 = vadd.f32 %v1343_v6, %v1340_v5  ;;  %283 = vadd.xlane.f32.xlu1 %v282_v3  ;;  %v1356_v11 = vld [vmem:[%s1319_s6 + $0xa0] sm:$0xff]  ;;  %v1359_v12 = vld [vmem:[%s1319_s6 + $0xa8] sm:$0xff]  ;;  %v1362_v13 = vld [vmem:[%s1319_s6 + $0x10] sm:$0xff]  ;;  %v285_v15 = vadd.f32 %v1353_v10, %v1350_v9  ;;  %vm506_vm9 = vcmask 1043459   ;;  %vm508_vm10 = vcmask 523264   ;;  %s1770_s7 = scalar_lea.vmem [#allocation5], %s1002_s30 }
  0x30   : > { %265 = vadd.xlane.f32.xlu2 %v264_v7  ;;  %2007 = vst [vmem:[#allocation8_spill] sm:$0xff] %v1359_v12  ;;  %v1365_v14 = vld [vmem:[%s1319_s6 + $0x18] sm:$0xff]  ;;  %v288_v16 = vadd.f32 %v1359_v12, %v1356_v11  ;;  %v1374_v18 = vld [vmem:[%s1319_s6 + $0x110] sm:$0xff]  ;;  %v1386_v22 = vld [vmem:[%s1319_s6 + $0x100] sm:$0xff]  ;;  %vm537_vm11 = vcmask 1043456   ;;  %vm533_vm12 = vcmask 31744  }
  0x31   : > { %259 = vadd.xlane.f32.xlu0 %v258_v8  ;;  %v261_v17 = vadd.f32 %v1365_v14, %v1362_v13  ;;  %2008 = vst [vmem:[#allocation9_spill] sm:$0xff] %v1374_v18  ;;  %v1377_v19 = vld [vmem:[%s1319_s6 + $0x118] sm:$0xff]  ;;  %v1380_v20 = vld [vmem:[%s1319_s6 + $0x30] sm:$0xff]  ;;  %v1389_v23 = vld [vmem:[%s1319_s6 + $0x108] sm:$0xff]  ;;  %s1017_s30 = sshll.u32 %s1248_s16, 9  ;;  %s918_s11 = sshll.u32 %s1770_s7, 4  ;;  %s919_s11 = int_to_ptr.vmem [resolvable:$true] %s918_s11 }
  0x32   : > { %2009 = vst [vmem:[#allocation10_spill] sm:$0xff] %v1377_v19  ;;  %v1383_v21 = vld [vmem:[%s1319_s6 + $0x38] sm:$0xff]  ;;  %v309_v24 = vadd.f32 %v1377_v19, %v1374_v18  ;;  %v306_v26 = vadd.f32 %v1389_v23, %v1386_v22  ;;  %v1398_v27 = vld [vmem:[%s1319_s6 + $0x120] sm:$0xff]  ;;  %v1401_v28 = vld [vmem:[%s1319_s6 + $0x128] sm:$0xff]  ;;  %s917_s10 = scalar_lea.hbm %s1959_s3, %s1017_s30  ;;  %s905_s19 = scalar_lea.sflag [#allocation4], %s1313_s29 }
  0x33   : > { %2010 = vst [vmem:[#allocation11_spill] sm:$0xff] %v1386_v22  ;;  %v267_v25 = vadd.f32 %v1383_v21, %v1380_v20  ;;  %v1404_v29 = vld [vmem:[%s1319_s6 + $0x180] sm:$0xff]  ;;  %v1407_v30 = vld [vmem:[%s1319_s6 + $0x188] sm:$0xff]  ;;  %v1410_v31 = vld [vmem:[%s1319_s6 + $0xb0] sm:$0xff]  ;;  %v312_v33 = vadd.f32 %v1401_v28, %v1398_v27  ;;  %s920_s17 = sshll.u32 %s917_s10, 4  ;;  %s1155_s26 = scalar_lea.hbm %s1959_s3, 1024  ;;  %s921_s17 = int_to_ptr.hbm [resolvable:$true] %s920_s17 }
  0x34   : > { %2011 = vst [vmem:[#allocation12_spill] sm:$0xff] %v1389_v23  ;;  %v1413_v32 = vld [vmem:[%s1319_s6 + $0xb8] sm:$0xff]  ;;  %v330_v34 = vadd.f32 %v1407_v30, %v1404_v29  ;;  %v1422_v36 = vld [vmem:[%s1319_s6 + $0x40] sm:$0xff]  ;;  %v1425_v37 = vld [vmem:[%s1319_s6 + $0x48] sm:$0xff]  ;;  %s1149_s16 = sshra.s32 %s921_s17, 4  ;;  %s1150_s16 = int_to_ptr.hbm [resolvable:$true] %s1149_s16 }
  0x35   : > { %2012 = vst [vmem:[#allocation13_spill] sm:$0xff] %v1398_v27  ;;  %v291_v35 = vadd.f32 %v1413_v32, %v1410_v31  ;;  %v1428_v38 = vld [vmem:[%s1319_s6 + $0xc0] sm:$0xff]  ;;  %v1431_v39 = vld [vmem:[%s1319_s6 + $0xc8] sm:$0xff]  ;;  %v1434_v40 = vld [vmem:[%s1319_s6 + $0x190] sm:$0xff]  ;;  %v270_v42 = vadd.f32 %v1425_v37, %v1422_v36  ;;  %s1151_s20 = scalar_lea.hbm %s1150_s16, 512  ;;  %p1156_p0 = scmp.lt.s32.totalorder %s1150_s16, %s1959_s3 }
  0x36   : > { %2013 = vst [vmem:[#allocation14_spill] sm:$0xff] %v1401_v28  ;;  %v1437_v41 = vld [vmem:[%s1319_s6 + $0x198] sm:$0xff]  ;;  %v294_v43 = vadd.f32 %v1431_v39, %v1428_v38  ;;  %v1446_v45 = vld [vmem:[%s1319_s6 + $0x1a0] sm:$0xff]  ;;  %v1449_v46 = vld [vmem:[%s1319_s6 + $0x1a8] sm:$0xff]  ;;  %p1152_p6 = scmp.ne.s32.totalorder %s1150_s16, %s1151_s20  ;;  %p1157_p1 = scmp.lt.s32.totalorder %s1155_s26, %s1151_s20 }
  0x37   : > { %286 = vadd.xlane.f32.xlu1 %v285_v15  ;;  %2014 = vst [vmem:[#allocation15_spill] sm:$0xff] %v1404_v29  ;;  %v333_v44 = vadd.f32 %v1437_v41, %v1434_v40  ;;  %v1452_v47 = vld [vmem:[%s1319_s6 + $0x50] sm:$0xff]  ;;  %v1455_v48 = vld [vmem:[%s1319_s6 + $0x58] sm:$0xff]  ;;  %v336_v51 = vadd.f32 %v1449_v46, %v1446_v45  ;;  %v1470_v54 = vld [vmem:[%s1319_s6 + $0x140] sm:$0xff] }
  0x38   : > { %289 = vadd.xlane.f32.xlu2 %v288_v16  ;;  %2015 = vst [vmem:[#allocation16_spill] sm:$0xff] %v1407_v30  ;;  %v1458_v49 = vld [vmem:[%s1319_s6 + $0x130] sm:$0xff]  ;;  %v1461_v50 = vld [vmem:[%s1319_s6 + $0x138] sm:$0xff]  ;;  %v273_v52 = vadd.f32 %v1455_v48, %v1452_v47  ;;  %v1473_v55 = vld [vmem:[%s1319_s6 + $0x148] sm:$0xff]  ;;  %p1153_p9 = pnand %p1152_p6, %p1277_p11  ;;  %p1158_p3 = por %p1157_p1, %p1156_p0 }
  0x39   : > { %262 = vadd.xlane.f32.xlu0 %v261_v17  ;;  %2016 = vst [vmem:[#allocation17_spill] sm:$0xff] %v1410_v31  ;;  %v315_v53 = vadd.f32 %v1461_v50, %v1458_v49  ;;  %v1476_v56 = vld [vmem:[%s1319_s6 + $0x1b0] sm:$0xff]  ;;  %v1479_v57 = vld [vmem:[%s1319_s6 + $0x1b8] sm:$0xff]  ;;  %v318_v60 = vadd.f32 %v1473_v55, %v1470_v54  ;;  %v1494_v63 = vld [vmem:[%s1319_s6 + $0xe0] sm:$0xff] }
  0x3a   : > { %2017 = vst [vmem:[#allocation18_spill] sm:$0xff] %v1413_v32  ;;  %v1482_v58 = vld [vmem:[%s1319_s6 + $0xd0] sm:$0xff]  ;;  %v1485_v59 = vld [vmem:[%s1319_s6 + $0xd8] sm:$0xff]  ;;  %v339_v61 = vadd.f32 %v1479_v57, %v1476_v56  ;;  %v1497_v3 = vld [vmem:[%s1319_s6 + $0xe8] sm:$0xff]  ;;  %p1154_p13 = pneg %p1153_p9 }
  0x3b   : > { %2018 = vst [vmem:[#allocation19_spill] sm:$0xff] %v1428_v38  ;;  %v297_v62 = vadd.f32 %v1485_v59, %v1482_v58  ;;  %v1500_v7 = vld [vmem:[%s1319_s6 + $0x150] sm:$0xff]  ;;  %v1503_v8 = vld [vmem:[%s1319_s6 + $0x158] sm:$0xff]  ;;  %v1506_v15 = vld [vmem:[%s1319_s6 + $0x60] sm:$0xff]  ;;  %v300_v17 = vadd.f32 %v1497_v3, %v1494_v63 }
  0x3c   : > { %2019 = vst [vmem:[#allocation20_spill] sm:$0xff] %v1431_v39  ;;  %v1509_v16 = vld [vmem:[%s1319_s6 + $0x68] sm:$0xff]  ;;  %v389_v23 = vld [vmem:[%s1957_s1 + $0x18] sm:$0xff]  ;;  %p1159_p4 = pnand %p1158_p3, %p1154_p13 }
  0x3d   : > { %2020 = vst [vmem:[#allocation21_spill] sm:$0xff] %v1434_v40 }
  0x3e   : > { %2021 = vst [vmem:[#allocation22_spill] sm:$0xff] %v1437_v41 }
  0x3f   : > { %310 = vadd.xlane.f32.xlu1 %v309_v24  ;;  %2022 = vst [vmem:[#allocation23_spill] sm:$0xff] %v1446_v45  ;;  %v321_v24 = vadd.f32 %v1503_v8, %v1500_v7 }
  0x40   : > { %268 = vadd.xlane.f32.xlu2 %v267_v25  ;;  %2023 = vst [vmem:[#allocation24_spill] sm:$0xff] %v1449_v46  ;;  %v276_v25 = vadd.f32 %v1509_v16, %v1506_v15  ;;  %v1575_v46 = vld [vmem:[%s1319_s6 + $0x1e8] sm:$0xff] }
  0x41   : > { %307 = vadd.xlane.f32.xlu0 %v306_v26  ;;  %2024 = vst [vmem:[#allocation25_spill] sm:$0xff] %v1458_v49  ;;  %v1518_v26 = vld [vmem:[%s1319_s6 + $0x70] sm:$0xff] }
  0x42   : > { %2025 = vst [vmem:[#allocation26_spill] sm:$0xff] %v1461_v50 }
  0x43   : > { %2026 = vst [vmem:[#allocation27_spill] sm:$0xff] %v1470_v54 }
  0x44   : > { %2027 = vst [vmem:[#allocation28_spill] sm:$0xff] %v1473_v55 }
  0x45   : > { %2028 = vst [vmem:[#allocation29_spill] sm:$0xff] %v1476_v56  ;;  %v1572_v56 = vld [vmem:[%s1319_s6 + $0x1e0] sm:$0xff] }
  0x46   : > { %2029 = vst [vmem:[#allocation30_spill] sm:$0xff] %v1479_v57  ;;  %v1569_v57 = vld [vmem:[%s1319_s6 + $0x1f8] sm:$0xff] }
  0x47   : > { %313 = vadd.xlane.f32.xlu1 %v312_v33  ;;  %2030 = vst [vmem:[#allocation31_spill] sm:$0xff] %v1494_v63  ;;  %v1521_v33 = vld [vmem:[%s1319_s6 + $0x78] sm:$0xff] }
  0x48   : > { %331 = vadd.xlane.f32.xlu2 %v330_v34  ;;  %2031 = vst [vmem:[#allocation32_spill] sm:$0xff] %v1497_v3  ;;  %v1524_v34 = vld [vmem:[%s1319_s6 + $0xf0] sm:$0xff] }
  0x49   : > { %292 = vadd.xlane.f32.xlu0 %v291_v35  ;;  %2032 = vst [vmem:[#allocation33_spill] sm:$0xff] %v1500_v7  ;;  %v1527_v35 = vld [vmem:[%s1319_s6 + $0xf8] sm:$0xff] }
  0x4a   : > { %2033 = vst [vmem:[#allocation34_spill] sm:$0xff] %v1503_v8 }
  0x4b   : > { %2034 = vst [vmem:[#allocation35_spill] sm:$0xff] %v1524_v34 }
  0x4c   : > { %2035 = vst [vmem:[#allocation36_spill] sm:$0xff] %v1527_v35 }
  0x4d   : > { %2045 = vst [vmem:[#allocation46_spill] sm:$0xff] %v1569_v57 }
  0x4e   : > { %2046 = vst [vmem:[#allocation47_spill] sm:$0xff] %v1572_v56 }
  0x4f   : > { %271 = vadd.xlane.f32.xlu1 %v270_v42  ;;  %v1530_v42 = vld [vmem:[%s1319_s6 + $0x1c0] sm:$0xff]  ;;  %2047 = vst [vmem:[#allocation48_spill] sm:$0xff] %v1575_v46 }
  0x50   : > { %295 = vadd.xlane.f32.xlu2 %v294_v43  ;;  %2036 = vst [vmem:[#allocation37_spill] sm:$0xff] %v1530_v42  ;;  %v1533_v43 = vld [vmem:[%s1319_s6 + $0x1c8] sm:$0xff] }
  0x51   : > { %334 = vadd.xlane.f32.xlu0 %v333_v44  ;;  %2037 = vst [vmem:[#allocation38_spill] sm:$0xff] %v1533_v43  ;;  %v279_v44 = vadd.f32 %v1521_v33, %v1518_v26 }
  0x57   : > { %337 = vadd.xlane.f32.xlu1 %v336_v51  ;;  %v303_v51 = vadd.f32 %v1527_v35, %v1524_v34 }
  0x58   : > { %274 = vadd.xlane.f32.xlu2 %v273_v52  ;;  %v342_v52 = vadd.f32 %v1533_v43, %v1530_v42 }
  0x59   : > { %316 = vadd.xlane.f32.xlu0 %v315_v53  ;;  %v1542_v53 = vld [vmem:[%s1319_s6 + $0x1d0] sm:$0xff] }
  0x5a   : > { %2038 = vst [vmem:[#allocation39_spill] sm:$0xff] %v1542_v53 }
  0x5f   : > { %319 = vadd.xlane.f32.xlu1 %v318_v60  ;;  %v1545_v60 = vld [vmem:[%s1319_s6 + $0x1d8] sm:$0xff] }
  0x60   : > { %340 = vadd.xlane.f32.xlu2 %v339_v61  ;;  %2039 = vst [vmem:[#allocation40_spill] sm:$0xff] %v1545_v60  ;;  %v1548_v61 = vld [vmem:[%s1319_s6 + $0x160] sm:$0xff] }
  0x61   : > { %298 = vadd.xlane.f32.xlu0 %v297_v62  ;;  %2040 = vst [vmem:[#allocation41_spill] sm:$0xff] %v1548_v61  ;;  %v1551_v62 = vld [vmem:[%s1319_s6 + $0x168] sm:$0xff] }
  0x62   : > { %2041 = vst [vmem:[#allocation42_spill] sm:$0xff] %v1551_v62 }
  0x67   : > { %301 = vadd.xlane.f32.xlu1 %v300_v17  ;;  %v1554_v17 = vld [vmem:[%s1319_s6 + $0x170] sm:$0xff] }
  0x68   : > { %322 = vadd.xlane.f32.xlu2 %v321_v24  ;;  %2042 = vst [vmem:[#allocation43_spill] sm:$0xff] %v1554_v17  ;;  %v1557_v24 = vld [vmem:[%s1319_s6 + $0x178] sm:$0xff] }
  0x69   : > { %277 = vadd.xlane.f32.xlu0 %v276_v25  ;;  %2043 = vst [vmem:[#allocation44_spill] sm:$0xff] %v1557_v24  ;;  %v345_v25 = vadd.f32 %v1545_v60, %v1542_v53  ;;  %v348_v53 = vadd.f32 %v1575_v46, %v1572_v56 }
  0x6f   : > { %280 = vadd.xlane.f32.xlu1 %v279_v44  ;;  %v324_v44 = vadd.f32 %v1551_v62, %v1548_v61 }
  0x70   : > { %304 = vadd.xlane.f32.xlu2 %v303_v51  ;;  %v327_v51 = vadd.f32 %v1557_v24, %v1554_v17 }
  0x71   : > { %343 = vadd.xlane.f32.xlu0 %v342_v52  ;;  %v1566_v52 = vld [vmem:[%s1319_s6 + $0x1f0] sm:$0xff] }
  0x72   : > { %2044 = vst [vmem:[#allocation45_spill] sm:$0xff] %v1566_v52  ;;  %v351_v60 = vadd.f32 %v1569_v57, %v1566_v52 }
  0x77   : > { %346 = vadd.xlane.f32.xlu1 %v345_v25  ;;  %v1976_v25 = vlaneseq }
  0x78   : > { %328 = vadd.xlane.f32.xlu2 %v327_v51 }
  0x79   : > { %325 = vadd.xlane.f32.xlu0 %v324_v44  ;;  %v1582_v41 = vand.u32 127, %v1976_v25 }
  0x7b   : > { %v1585_v30 = vadd.s32 4294967280, %v1582_v41  ;;  %v1588_v62 = vadd.s32 4294967288, %v1582_v41  ;;  %v1641_v42 = vadd.s32 4294967272, %v1582_v41  ;;  %v1647_v17 = vadd.s32 4294967256, %v1582_v41 }
  0x7f   : > { %352 = vadd.xlane.f32.xlu1 %v351_v60 }
  0x81   : > { %349 = vadd.xlane.f32.xlu0 %v348_v53 }
  0xa2   : > { %v284_v45 = vpop.xlane.xlu1 %283 }
  0xa3   : > { %v266_v44 = vpop.xlane.xlu2 %265  ;;  %v362_v40 = vmul.f32 0.00390625, %v284_v45 }
  0xa4   : > { %v260_v51 = vpop.xlane.xlu0 %259  ;;  %v356_v29 = vmul.f32 0.00390625, %v266_v44 }
  0xa5   : > { %v354_v57 = vmul.f32 0.00390625, %v260_v51  ;;  %v457_v61 = vperm.slane %v362_v40, %v1582_v41 }
  0xa6   : > { %v434_v25 = vperm.slane %v356_v29, %v1585_v30 }
  0xa7   : > { %v428_v8 = vperm.slane %v354_v57, %v1582_v41 }
  0xaa   : > { %v287_v52 = vpop.xlane.xlu1 %286 }
  0xab   : > { %v363_v46 = vmul.f32 0.00390625, %v287_v52  ;;  %v290_v60 = vpop.xlane.xlu2 %289 }
  0xac   : > { %v263_v53 = vpop.xlane.xlu0 %262  ;;  %v364_v22 = vmul.f32 0.00390625, %v290_v60 }
  0xad   : > { %v355_v56 = vmul.f32 0.00390625, %v263_v53  ;;  %v458_v45 = vperm.slane %v363_v46, %v1588_v62 }
  0xae   : > { %v460_v60 = vperm.slane %v364_v22, %v1585_v30  ;;  %v1659_v22 = vadd.s32 4294967240, %v1582_v41 }
  0xaf   : > { %v430_v44 = vperm.slane %v355_v56, %v1588_v62  ;;  %v459_v7 = vsel %vm431_vm0, %v458_v45, %v457_v61  ;;  %v392_v45 = vld [vmem:[%s1957_s1 + $0x30] sm:$0xff] }
  0xb1   : > { %v432_v51 = vsel %vm431_vm0, %v430_v44, %v428_v8  ;;  %v391_v44 = vld [vmem:[%s1957_s1 + $0x28] sm:$0xff] }
  0xb2   : > { %v1598_v52 = vsel %vm435_vm1, %v434_v25, %v432_v51  ;;  %v311_v55 = vpop.xlane.xlu1 %310  ;;  %v393_v25 = vld [vmem:[%s1957_s1 + $0x38] sm:$0xff]  ;;  %v390_v51 = vld [vmem:[%s1957_s1 + $0x20] sm:$0xff] }
  0xb3   : > { %v269_v53 = vpop.xlane.xlu2 %268  ;;  %519 = vmatpush.msra.mxu0 %v393_v25 }
  0xb4   : > { %v1600_v54 = vpop.xlane.xlu0 %307 }
  0xb5   : > { %520 = vmatpush.msra.mxu0 %v392_v45  ;;  %v388_v45 = vld [vmem:[%s1957_s1 + $0x10] sm:$0xff] }
  0xb7   : > { %521 = vmatpush.msra.mxu0 %v391_v44  ;;  %v387_v44 = vld [vmem:[%s1957_s1 + $0x8] sm:$0xff] }
  0xb9   : > { %522 = vmatpush.msra.mxu0 %v390_v51  ;;  %v386_v51 = vld [vmem:[%s1957_s1] sm:$0xff] }
  0xba   : > { %v1602_v40 = vpop.xlane.xlu1 %313 }
  0xbb   : > { %v1604_v29 = vpop.xlane.xlu2 %331  ;;  %523 = vmatpush.msra.mxu0 %v389_v23  ;;  %v357_v23 = vmul.f32 0.00390625, %v269_v53 }
  0xbc   : > { %v293_v46 = vpop.xlane.xlu0 %292 }
  0xbd   : > { %524 = vmatpush.msra.mxu0 %v388_v45  ;;  %v365_v3 = vmul.f32 0.00390625, %v293_v46  ;;  %v1644_v45 = vadd.s32 4294967264, %v1582_v41  ;;  %v438_v53 = vperm.slane %v357_v23, %v1641_v42 }
  0xbf   : > { %525 = vmatpush.msra.mxu0 %v387_v44  ;;  %v462_v46 = vperm.slane %v365_v3, %v1641_v42  ;;  %v440_v3 = vsel %vm439_vm2, %v438_v53, %v1598_v52  ;;  %v372_v53 = vmul.f32 0.00390625, %v1602_v40 }
  0xc1   : > { %526 = vmatpush.msra.mxu0 %v386_v51  ;;  %v1651_v51 = vadd.s32 4294967248, %v1582_v41  ;;  %v475_v40 = vperm.slane %v372_v53, %v1585_v30 }
  0xc2   : > { %v272_v57 = vpop.xlane.xlu1 %271 }
  0xc3   : > { %v296_v50 = vpop.xlane.xlu2 %295  ;;  %v358_v63 = vmul.f32 0.00390625, %v272_v57 }
  0xc4   : > { %v1606_v49 = vpop.xlane.xlu0 %334  ;;  %v366_v24 = vmul.f32 0.00390625, %v296_v50 }
  0xc5   : > { %v442_v50 = vperm.slane %v358_v63, %v1644_v45 }
  0xc6   : > { %v464_v57 = vperm.slane %v366_v24, %v1644_v45 }
  0xc7   : > { %v444_v12 = vsel %vm443_vm3, %v442_v50, %v440_v3  ;;  %v379_v3 = vmul.f32 0.00390625, %v1606_v49 }
  0xca   : > { %v1608_v56 = vpop.xlane.xlu1 %337 }
  0xcb   : > { %v275_v61 = vpop.xlane.xlu2 %274 }
  0xcc   : > { %v1610_v8 = vpop.xlane.xlu0 %316  ;;  %v359_v39 = vmul.f32 0.00390625, %v275_v61 }
  0xce   : > { %v446_v61 = vperm.slane %v359_v39, %v1647_v17 }
  0xd2   : > { %v1624_v19 = vpop.xlane.xlu1 %319 }
  0xd3   : > { %v1626_v18 = vpop.xlane.xlu2 %340 }
  0xd4   : > { %v299_v25 = vpop.xlane.xlu0 %298 }
  0xd5   : > { %v367_v44 = vmul.f32 0.00390625, %v299_v25  ;;  %v461_v25 = vsel %vm435_vm1, %v460_v60, %v459_v7  ;;  %v370_v7 = vmul.f32 0.00390625, %v1600_v54  ;;  %v448_v60 = vsel %vm447_vm4, %v446_v61, %v444_v12 }
  0xd6   : > { %v463_v27 = vsel %vm439_vm2, %v462_v46, %v461_v25  ;;  %v373_v54 = vmul.f32 0.00390625, %v1610_v8  ;;  %v378_v25 = vmul.f32 0.00390625, %v1604_v29  ;;  %v380_v8 = vmul.f32 0.00390625, %v1608_v56 }
  0xd7   : > { %v466_v23 = vperm.slane %v367_v44, %v1647_v17  ;;  %v472_v50 = vperm.slane %v370_v7, %v1582_v41 }
  0xda   : > { %v302_v43 = vpop.xlane.xlu1 %301 }
  0xdb   : > { %v323_v35 = vpop.xlane.xlu2 %322  ;;  %v368_v32 = vmul.f32 0.00390625, %v302_v43 }
  0xdc   : > { %v278_v34 = vpop.xlane.xlu0 %277 }
  0xdd   : > { %v360_v38 = vmul.f32 0.00390625, %v278_v34  ;;  %v371_v34 = vmul.f32 0.00390625, %v311_v55  ;;  %v468_v63 = vperm.slane %v368_v32, %v1651_v51 }
  0xdf   : > { %v450_v43 = vperm.slane %v360_v38, %v1651_v51  ;;  %v465_v38 = vsel %vm443_vm3, %v464_v57, %v463_v27  ;;  %v473_v12 = vperm.slane %v371_v34, %v1588_v62  ;;  %v374_v57 = vmul.f32 0.00390625, %v1624_v19 }
  0xe0   : > { %v467_v44 = vsel %vm447_vm4, %v466_v23, %v465_v38  ;;  %v375_v23 = vmul.f32 0.00390625, %v323_v35  ;;  %v381_v38 = vmul.f32 0.00390625, %v1626_v18  ;;  %v487_v35 = vperm.slane %v378_v25, %v1582_v41 }
  0xe1   : > { %v469_v46 = vsel %vm451_vm5, %v468_v63, %v467_v44  ;;  %v474_v7 = vsel %vm431_vm0, %v473_v12, %v472_v50  ;;  %v479_v19 = vperm.slane %v374_v57, %v1644_v45  ;;  %v488_v44 = vperm.slane %v379_v3, %v1588_v62 }
  0xe2   : > { %v281_v31 = vpop.xlane.xlu1 %280  ;;  %v481_v29 = vperm.slane %v375_v23, %v1647_v17  ;;  %v476_v49 = vsel %vm435_vm1, %v475_v40, %v474_v7  ;;  %v492_v18 = vperm.slane %v381_v38, %v1641_v42 }
  0xe3   : > { %v361_v24 = vmul.f32 0.00390625, %v281_v31  ;;  %v305_v28 = vpop.xlane.xlu2 %304  ;;  %v452_v31 = vsel %vm451_vm5, %v450_v43, %v448_v60  ;;  %v489_v62 = vsel %vm431_vm0, %v488_v44, %v487_v35 }
  0xe4   : > { %v344_v39 = vpop.xlane.xlu0 %343  ;;  %v369_v55 = vmul.f32 0.00390625, %v305_v28 }
  0xe5   : > { %v454_v52 = vperm.slane %v361_v24, %v1659_v22  ;;  %v382_v60 = vmul.f32 0.00390625, %v344_v39 }
  0xe6   : > { %v470_v32 = vperm.slane %v369_v55, %v1659_v22  ;;  %v477_v55 = vperm.slane %v373_v54, %v1641_v42 }
  0xe7   : > { %v456_v28 = vsel %vm455_vm6, %v454_v52, %v452_v31  ;;  %v494_v39 = vperm.slane %v382_v60, %v1644_v45 }
  0xe8   : > { %v471_v27 = vsel %vm455_vm6, %v470_v32, %v469_v46  ;;  %v490_v32 = vperm.slane %v380_v8, %v1585_v30  ;;  %v478_v53 = vsel %vm439_vm2, %v477_v55, %v476_v49 }
  0xe9   : > { %v503_v61 = vsel %vm502_vm7, %v471_v27, %v456_v28  ;;  %v480_v46 = vsel %vm443_vm3, %v479_v19, %v478_v53 }
  0xea   : > { %v347_v43 = vpop.xlane.xlu1 %346  ;;  %v482_v41 = vsel %vm447_vm4, %v481_v29, %v480_v46  ;;  %v491_v57 = vsel %vm435_vm1, %v490_v32, %v489_v62 }
  0xeb   : > { %v329_v24 = vpop.xlane.xlu2 %328  ;;  %v383_v56 = vmul.f32 0.00390625, %v347_v43  ;;  %v493_v42 = vsel %vm439_vm2, %v492_v18, %v491_v57 }
  0xec   : > { %v326_v63 = vpop.xlane.xlu0 %325  ;;  %v377_v52 = vmul.f32 0.00390625, %v329_v24  ;;  %v495_v45 = vsel %vm443_vm3, %v494_v39, %v493_v42 }
  0xed   : > { %v376_v34 = vmul.f32 0.00390625, %v326_v63  ;;  %v496_v27 = vperm.slane %v383_v56, %v1647_v17 }
  0xee   : > { %v485_v28 = vperm.slane %v377_v52, %v1659_v22 }
  0xef   : > { %v483_v31 = vperm.slane %v376_v34, %v1651_v51  ;;  %v497_v17 = vsel %vm447_vm4, %v496_v27, %v495_v45  ;;  %v2048_v34 = vlaneseq }
  0xf1   : > { %v484_v12 = vsel %vm451_vm5, %v483_v31, %v482_v41  ;;  %v1720_v7 = vshrl.u32 %v2048_v34, 7 }
  0xf2   : > { %v353_v54 = vpop.xlane.xlu1 %352  ;;  %v486_v40 = vsel %vm455_vm6, %v485_v28, %v484_v12 }
  0xf3   : > { %v385_v50 = vmul.f32 0.00390625, %v353_v54  ;;  %v505_v24 = vsel %vm504_vm8, %v486_v40, %v503_v61  ;;  %1068 = vset.pattern.permute.xlu2 %v1720_v7  ;;  %v1724_v19 = vadd.s32 16, %v1720_v7  ;;  %v1727_v61 = vadd.s32 8, %v1720_v7 }
  0xf4   : > { %v350_v30 = vpop.xlane.xlu0 %349  ;;  %v1732_v28 = vadd.s32 40, %v1720_v7  ;;  %v1735_v54 = vadd.s32 24, %v1720_v7  ;;  %v1741_v27 = vadd.s32 56, %v1720_v7  ;;  %v607_v12 = vadd.s32 32, %v1720_v7 }
  0xf5   : > { %v384_v25 = vmul.f32 0.00390625, %v350_v30  ;;  %v500_v23 = vperm.slane %v385_v50, %v1659_v22  ;;  %v532_v22 = vld [vmem:[%s1958_s2] sm:$0xf]  ;;  %1070 = vset.pattern.permute.xlu1 %v1724_v19  ;;  %1069 = vset.pattern.permute.xlu0 %v1727_v61  ;;  %v1747_v30 = vadd.s32 48, %v1720_v7 }
  0xf6   : > { %1005 = vmatpush.msk.msra.mxu1 %vm537_vm11, %v532_v22 }
  0xf7   : > { %v498_v43 = vperm.slane %v384_v25, %v1651_v51 }
  0xf9   : > { %v499_v3 = vsel %vm451_vm5, %v498_v43, %v497_v17 }
  0xfa   : > { %v501_v63 = vsel %vm455_vm6, %v500_v23, %v499_v3 }
  0xfb   : > { %v507_v8 = vsel %vm506_vm9, %v501_v63, %v505_v24 }
  0xfc   : > { %1004 = vmatmul.msk.f32.vlgmr.msra.gmra.mxu0 %vm508_vm10, %v507_v8 }
 0x179   : > { %v528_v51 = vpop.f32.mrf.mxu0 }
 0x17a   : > { %v531_v55 = vmax.f32 %v528_v51, 0.0 }
 0x17c   : > { %1006 = vmatmul.msk.f32.vlgmr.msra.gmra.mxu1 %vm533_vm12, %v531_v55 }
 0x1f9   : > { %v558_v38 = vpop.f32.mrf.mxu1 }
 0x1fa   : > { %v1007_v35 = vmul.f32 -1.442695, %v558_v38 }
 0x1fc   : > { %1101 = vpow2.f32 %v1007_v35  ;;  %v2050_v35 = vld [vmem:[#allocation13_spill] sm:$0xff] }
 0x202   : > { %v1102_v29 = vpop.eup %1101 }
 0x203   : > { %v564_v60 = vadd.f32 1.0, %v1102_v29 }
 0x205   : > { %1103 = vrcp.f32 %v564_v60  ;;  %v576_v56 = vand.u32 2147483648, %v564_v60  ;;  %v574_v32 = vand.u32 2147483647, %v564_v60  ;;  %vm570_vm14 = vweird.f32 %v564_v60 }
 0x207   : > { %v577_v46 = vor.u32 1.1754944e-38, %v576_v56  ;;  %vm575_vm0 = vcmp.eq.f32.partialorder %v574_v32, 8.507059e+37  ;;  %v2054_v32 = vld [vmem:[#allocation19_spill] sm:$0xff] }
 0x20b   : > { %v1104_v52 = vpop.eup %1103 }
 0x20c   : > { %v566_v49 = vmul.f32 %v1104_v52, %v564_v60  ;;  %vm571_vm13 = vweird.f32 %v1104_v52  ;;  %v2051_v60 = vld [vmem:[#allocation14_spill] sm:$0xff] }
 0x20d   : > { %vm572_vm15 = vmor %vm570_vm14, %vm571_vm13 }
 0x20e   : > { %v567_v44 = vsub.f32 1.0, %v566_v49  ;;  %v2053_v49 = vld [vmem:[#allocation18_spill] sm:$0xff] }
 0x210   : > { %v568_v31 = vmul.f32 %v1104_v52, %v567_v44 }
 0x212   : > { %v569_v53 = vadd.f32 %v1104_v52, %v568_v31 }
 0x214   : > { %v573_v18 = vsel %vm572_vm15, %v1104_v52, %v569_v53  ;;  %v2052_v52 = vld [vmem:[#allocation17_spill] sm:$0xff] }
 0x215   : > { %v578_v41 = vsel %vm575_vm0, %v577_v46, %v573_v18  ;;  %v2056_v18 = vld [vmem:[#allocation43_spill] sm:$0xff] }
 0x216   : > { %v580_v39 = vperm.slane %v578_v41, 0  ;;  %v629_v62 = vperm.slane %v578_v41, 1  ;;  %v1752_v50 = vperm.slane %v578_v41, 2  ;;  %v1760_v57 = vperm.slane %v578_v41, 3 }
 0x218   : > { %597 = vperm.xlu1 %1070, %v580_v39   ;;  %591 = vperm.xlu0 %1069, %v580_v39  }
 0x219   : > { %585 = vperm.xlu2 %1068, %v580_v39  }
 0x220   : > { %1073 = vset.pattern.permute.xlu1 %v1732_v28  ;;  %1076 = vset.pattern.permute.xlu0 %v1720_v7 }
 0x221   : > { %1071 = vset.pattern.permute.xlu2 %v1735_v54 }
 0x228   : > { %615 = vperm.xlu1 %1073, %v580_v39   ;;  %634 = vperm.xlu0 %1076, %v629_v62  }
 0x229   : > { %603 = vperm.xlu2 %1071, %v580_v39  }
 0x230   : > { %1075 = vset.pattern.permute.xlu1 %v1741_v27  ;;  %1081 = vset.pattern.permute.xlu0 %v1732_v28 }
 0x231   : > { %1072 = vset.pattern.permute.xlu2 %v607_v12 }
 0x238   : > { %627 = vperm.xlu1 %1075, %v580_v39   ;;  %664 = vperm.xlu0 %1081, %v629_v62  }
 0x239   : > { %609 = vperm.xlu2 %1072, %v580_v39  }
 0x240   : > { %1078 = vset.pattern.permute.xlu1 %v1724_v19  ;;  %1086 = vset.pattern.permute.xlu0 %v1724_v19 }
 0x241   : > { %1074 = vset.pattern.permute.xlu2 %v1747_v30 }
 0x248   : > { %646 = vperm.xlu1 %1078, %v629_v62   ;;  %695 = vperm.xlu0 %1086, %v1752_v50  }
 0x249   : > { %621 = vperm.xlu2 %1074, %v580_v39   ;;  %v2057_v39 = vld [vmem:[#allocation44_spill] sm:$0xff] }
 0x250   : > { %1080 = vset.pattern.permute.xlu1 %v607_v12  ;;  %1091 = vset.pattern.permute.xlu0 %v1741_v27 }
 0x251   : > { %1077 = vset.pattern.permute.xlu2 %v1727_v61 }
 0x258   : > { %658 = vperm.xlu1 %1080, %v629_v62   ;;  %725 = vperm.xlu0 %1091, %v1752_v50  }
 0x259   : > { %640 = vperm.xlu2 %1077, %v629_v62  }
 0x260   : > { %1083 = vset.pattern.permute.xlu1 %v1741_v27  ;;  %1096 = vset.pattern.permute.xlu0 %v607_v12 }
 0x261   : > { %1079 = vset.pattern.permute.xlu2 %v1735_v54 }
 0x268   : > { %676 = vperm.xlu1 %1083, %v629_v62   ;;  %756 = vperm.xlu0 %1096, %v1760_v57  }
 0x269   : > { %652 = vperm.xlu2 %1079, %v629_v62  }
 0x270   : > { %1085 = vset.pattern.permute.xlu1 %v1727_v61  ;;  %1100 = vset.pattern.permute.xlu0 %v1741_v27 }
 0x271   : > { %1082 = vset.pattern.permute.xlu2 %v1747_v30 }
 0x273   : > { %v586_v25 = vpop.permute.xlu2 %585 }
 0x274   : > { %v776_v42 = vmul.f32 %v586_v25, %v1340_v5  ;;  %v777_v23 = vmul.f32 %v586_v25, %v1343_v6 }
 0x276   : > { %840 = vst [vmem:[%s1770_s7] sm:$0xff] %v776_v42 }
 0x277   : > { %841 = vst [vmem:[%s1770_s7 + $0x8] sm:$0xff] %v777_v23 }
 0x278   : > { %689 = vperm.xlu1 %1085, %v1752_v50  }
 0x279   : > { %670 = vperm.xlu2 %1082, %v629_v62  }
 0x280   : > { %1088 = vset.pattern.permute.xlu1 %v607_v12  ;;  %v2058_v12 = vld [vmem:[#allocation31_spill] sm:$0xff] }
 0x281   : > { %1084 = vset.pattern.permute.xlu2 %v1720_v7 }
 0x283   : > { %v604_v5 = vpop.permute.xlu2 %603 }
 0x284   : > { %v782_v6 = vmul.f32 %v604_v5, %v1380_v20  ;;  %v783_v45 = vmul.f32 %v604_v5, %v1383_v21  ;;  %v2060_v5 = vld [vmem:[#allocation35_spill] sm:$0xff] }
 0x286   : > { %846 = vst [vmem:[%s1770_s7 + $0x30] sm:$0xff] %v782_v6 }
 0x287   : > { %847 = vst [vmem:[%s1770_s7 + $0x38] sm:$0xff] %v783_v45  ;;  %v2061_v45 = vld [vmem:[#allocation36_spill] sm:$0xff] }
 0x288   : > { %707 = vperm.xlu1 %1088, %v1752_v50  }
 0x289   : > { %683 = vperm.xlu2 %1084, %v1752_v50  }
 0x28a   : > { %v598_v43 = vpop.permute.xlu1 %597  ;;  %v592_v40 = vpop.permute.xlu0 %591 }
 0x28b   : > { %v780_v17 = vmul.f32 %v598_v43, %v1332_v2  ;;  %v781_v3 = vmul.f32 %v598_v43, %v1337_v4  ;;  %v778_v63 = vmul.f32 %v592_v40, %v1362_v13  ;;  %v779_v20 = vmul.f32 %v592_v40, %v1365_v14  ;;  %v2062_v40 = vld [vmem:[#allocation37_spill] sm:$0xff] }
 0x28d   : > { %844 = vst [vmem:[%s1770_s7 + $0x20] sm:$0xff] %v780_v17  ;;  %v2063_v17 = vld [vmem:[#allocation38_spill] sm:$0xff] }
 0x28e   : > { %845 = vst [vmem:[%s1770_s7 + $0x28] sm:$0xff] %v781_v3 }
 0x28f   : > { %842 = vst [vmem:[%s1770_s7 + $0x10] sm:$0xff] %v778_v63 }
 0x290   : > { %843 = vst [vmem:[%s1770_s7 + $0x18] sm:$0xff] %v779_v20  ;;  %1090 = vset.pattern.permute.xlu1 %v1747_v30  ;;  %v2064_v20 = vld [vmem:[#allocation11_spill] sm:$0xff] }
 0x291   : > { %1087 = vset.pattern.permute.xlu2 %v1735_v54 }
 0x293   : > { %v610_v21 = vpop.permute.xlu2 %609 }
 0x294   : > { %v784_v2 = vmul.f32 %v610_v21, %v1422_v36  ;;  %v785_v4 = vmul.f32 %v610_v21, %v1425_v37 }
 0x296   : > { %848 = vst [vmem:[%s1770_s7 + $0x40] sm:$0xff] %v784_v2  ;;  %v2065_v2 = vld [vmem:[#allocation12_spill] sm:$0xff] }
 0x297   : > { %849 = vst [vmem:[%s1770_s7 + $0x48] sm:$0xff] %v785_v4 }
 0x298   : > { %719 = vperm.xlu1 %1090, %v1752_v50  }
 0x299   : > { %701 = vperm.xlu2 %1087, %v1752_v50  }
 0x29a   : > { %v616_v13 = vpop.permute.xlu1 %615  ;;  %v635_v14 = vpop.permute.xlu0 %634 }
 0x29b   : > { %v786_v24 = vmul.f32 %v616_v13, %v1452_v47  ;;  %v787_v8 = vmul.f32 %v616_v13, %v1455_v48  ;;  %v792_v22 = vmul.f32 %v635_v14, %v1326_v0  ;;  %v793_v36 = vmul.f32 %v635_v14, %v1329_v1  ;;  %v2066_v14 = vld [vmem:[#allocation9_spill] sm:$0xff] }
 0x29d   : > { %850 = vst [vmem:[%s1770_s7 + $0x50] sm:$0xff] %v786_v24 }
 0x29e   : > { %851 = vst [vmem:[%s1770_s7 + $0x58] sm:$0xff] %v787_v8  ;;  %v2067_v8 = vld [vmem:[#allocation10_spill] sm:$0xff] }
 0x29f   : > { %856 = vst [vmem:[%s1770_s7 + $0x80] sm:$0xff] %v792_v22 }
 0x2a0   : > { %857 = vst [vmem:[%s1770_s7 + $0x88] sm:$0xff] %v793_v36  ;;  %1093 = vset.pattern.permute.xlu1 %v1727_v61  ;;  %v2068_v36 = vld [vmem:[#allocation25_spill] sm:$0xff] }
 0x2a1   : > { %1089 = vset.pattern.permute.xlu2 %v1732_v28 }
 0x2a3   : > { %v622_v37 = vpop.permute.xlu2 %621 }
 0x2a4   : > { %v788_v47 = vmul.f32 %v622_v37, %v1506_v15  ;;  %v789_v48 = vmul.f32 %v622_v37, %v1509_v16 }
 0x2a6   : > { %852 = vst [vmem:[%s1770_s7 + $0x60] sm:$0xff] %v788_v47  ;;  %v2069_v47 = vld [vmem:[#allocation26_spill] sm:$0xff] }
 0x2a7   : > { %853 = vst [vmem:[%s1770_s7 + $0x68] sm:$0xff] %v789_v48 }
 0x2a8   : > { %738 = vperm.xlu1 %1093, %v1760_v57  }
 0x2a9   : > { %713 = vperm.xlu2 %1089, %v1752_v50   ;;  %v2059_v50 = vld [vmem:[#allocation32_spill] sm:$0xff] }
 0x2aa   : > { %v628_v0 = vpop.permute.xlu1 %627  ;;  %v665_v1 = vpop.permute.xlu0 %664 }
 0x2ab   : > { %v790_v51 = vmul.f32 %v628_v0, %v1518_v26  ;;  %v791_v55 = vmul.f32 %v628_v0, %v1521_v33  ;;  %v802_v34 = vmul.f32 %v665_v1, %v1482_v58  ;;  %v803_v15 = vmul.f32 %v665_v1, %v1485_v59 }
 0x2ad   : > { %854 = vst [vmem:[%s1770_s7 + $0x70] sm:$0xff] %v790_v51  ;;  %v2071_v51 = vld [vmem:[#allocation28_spill] sm:$0xff] }
 0x2ae   : > { %855 = vst [vmem:[%s1770_s7 + $0x78] sm:$0xff] %v791_v55 }
 0x2af   : > { %866 = vst [vmem:[%s1770_s7 + $0xd0] sm:$0xff] %v802_v34 }
 0x2b0   : > { %867 = vst [vmem:[%s1770_s7 + $0xd8] sm:$0xff] %v803_v15  ;;  %1095 = vset.pattern.permute.xlu1 %v1735_v54  ;;  %v2072_v15 = vld [vmem:[#allocation33_spill] sm:$0xff] }
 0x2b1   : > { %1092 = vset.pattern.permute.xlu2 %v1720_v7  ;;  %v2049_v7 = vld [vmem:[#allocation8_spill] sm:$0xff] }
 0x2b3   : > { %v641_v16 = vpop.permute.xlu2 %640 }
 0x2b4   : > { %v794_v26 = vmul.f32 %v641_v16, %v1350_v9  ;;  %v795_v33 = vmul.f32 %v641_v16, %v1353_v10 }
 0x2b6   : > { %858 = vst [vmem:[%s1770_s7 + $0x90] sm:$0xff] %v794_v26  ;;  %v2073_v26 = vld [vmem:[#allocation34_spill] sm:$0xff] }
 0x2b7   : > { %859 = vst [vmem:[%s1770_s7 + $0x98] sm:$0xff] %v795_v33 }
 0x2b8   : > { %750 = vperm.xlu1 %1095, %v1760_v57  }
 0x2b9   : > { %732 = vperm.xlu2 %1092, %v1760_v57  }
 0x2ba   : > { %v647_v58 = vpop.permute.xlu1 %646  ;;  %v696_v59 = vpop.permute.xlu0 %695 }
 0x2bb   : > { %v796_v61 = vmul.f32 %v647_v58, %v1356_v11  ;;  %v797_v38 = vmul.f32 %v647_v58, %v2049_v7  ;;  %v812_v29 = vmul.f32 %v696_v59, %v2050_v35  ;;  %v813_v9 = vmul.f32 %v696_v59, %v2051_v60  ;;  %v2074_v59 = vld [vmem:[#allocation41_spill] sm:$0xff]  ;;  %v2075_v7 = vld [vmem:[#allocation42_spill] sm:$0xff] }
 0x2bd   : > { %860 = vst [vmem:[%s1770_s7 + $0xa0] sm:$0xff] %v796_v61 }
 0x2be   : > { %861 = vst [vmem:[%s1770_s7 + $0xa8] sm:$0xff] %v797_v38 }
 0x2bf   : > { %876 = vst [vmem:[%s1770_s7 + $0x120] sm:$0xff] %v812_v29  ;;  %v2076_v29 = vld [vmem:[#allocation15_spill] sm:$0xff] }
 0x2c0   : > { %877 = vst [vmem:[%s1770_s7 + $0x128] sm:$0xff] %v813_v9  ;;  %1098 = vset.pattern.permute.xlu1 %v1747_v30  ;;  %v2077_v9 = vld [vmem:[#allocation16_spill] sm:$0xff] }
 0x2c1   : > { %1094 = vset.pattern.permute.xlu2 %v1724_v19  ;;  %v2055_v19 = vld [vmem:[#allocation20_spill] sm:$0xff] }
 0x2c3   : > { %v653_v10 = vpop.permute.xlu2 %652 }
 0x2c4   : > { %v798_v11 = vmul.f32 %v653_v10, %v2052_v52  ;;  %v799_v44 = vmul.f32 %v653_v10, %v2053_v49 }
 0x2c6   : > { %862 = vst [vmem:[%s1770_s7 + $0xb0] sm:$0xff] %v798_v11  ;;  %v2078_v11 = vld [vmem:[#allocation21_spill] sm:$0xff] }
 0x2c7   : > { %863 = vst [vmem:[%s1770_s7 + $0xb8] sm:$0xff] %v799_v44  ;;  %v2079_v44 = vld [vmem:[#allocation22_spill] sm:$0xff] }
 0x2c8   : > { %768 = vperm.xlu1 %1098, %v1760_v57  }
 0x2c9   : > { %744 = vperm.xlu2 %1094, %v1760_v57  }
 0x2ca   : > { %v659_v56 = vpop.permute.xlu1 %658  ;;  %v726_v31 = vpop.permute.xlu0 %725 }
 0x2cb   : > { %v800_v53 = vmul.f32 %v659_v56, %v2054_v32  ;;  %v801_v46 = vmul.f32 %v659_v56, %v2055_v19  ;;  %v822_v41 = vmul.f32 %v726_v31, %v2056_v18  ;;  %v823_v54 = vmul.f32 %v726_v31, %v2057_v39  ;;  %v2080_v32 = vld [vmem:[#allocation23_spill] sm:$0xff]  ;;  %v2081_v19 = vld [vmem:[#allocation24_spill] sm:$0xff] }
 0x2cd   : > { %864 = vst [vmem:[%s1770_s7 + $0xc0] sm:$0xff] %v800_v53 }
 0x2ce   : > { %865 = vst [vmem:[%s1770_s7 + $0xc8] sm:$0xff] %v801_v46 }
 0x2cf   : > { %886 = vst [vmem:[%s1770_s7 + $0x170] sm:$0xff] %v822_v41  ;;  %v2082_v41 = vld [vmem:[#allocation29_spill] sm:$0xff] }
 0x2d0   : > { %887 = vst [vmem:[%s1770_s7 + $0x178] sm:$0xff] %v823_v54  ;;  %v2083_v54 = vld [vmem:[#allocation30_spill] sm:$0xff] }
 0x2d1   : > { %1097 = vset.pattern.permute.xlu2 %v1732_v28 }
 0x2d3   : > { %v671_v62 = vpop.permute.xlu2 %670 }
 0x2d4   : > { %v804_v30 = vmul.f32 %v671_v62, %v2058_v12  ;;  %v805_v25 = vmul.f32 %v671_v62, %v2059_v50 }
 0x2d6   : > { %868 = vst [vmem:[%s1770_s7 + $0xe0] sm:$0xff] %v804_v30  ;;  %v2084_v30 = vld [vmem:[#allocation39_spill] sm:$0xff] }
 0x2d7   : > { %869 = vst [vmem:[%s1770_s7 + $0xe8] sm:$0xff] %v805_v25  ;;  %v2085_v25 = vld [vmem:[#allocation40_spill] sm:$0xff] }
 0x2d9   : > { %762 = vperm.xlu2 %1097, %v1760_v57  }
 0x2da   : > { %v677_v42 = vpop.permute.xlu1 %676  ;;  %v757_v23 = vpop.permute.xlu0 %756 }
 0x2db   : > { %v806_v6 = vmul.f32 %v677_v42, %v2060_v5  ;;  %v807_v43 = vmul.f32 %v677_v42, %v2061_v45  ;;  %v832_v28 = vmul.f32 %v757_v23, %v2062_v40  ;;  %v833_v3 = vmul.f32 %v757_v23, %v2063_v17  ;;  %v2086_v5 = vld [vmem:[#allocation47_spill] sm:$0xff]  ;;  %v2087_v45 = vld [vmem:[#allocation48_spill] sm:$0xff] }
 0x2dd   : > { %870 = vst [vmem:[%s1770_s7 + $0xf0] sm:$0xff] %v806_v6 }
 0x2de   : > { %871 = vst [vmem:[%s1770_s7 + $0xf8] sm:$0xff] %v807_v43 }
 0x2df   : > { %896 = vst [vmem:[%s1770_s7 + $0x1c0] sm:$0xff] %v832_v28  ;;  %v2088_v28 = vld [vmem:[#allocation45_spill] sm:$0xff] }
 0x2e0   : > { %897 = vst [vmem:[%s1770_s7 + $0x1c8] sm:$0xff] %v833_v3  ;;  %v2089_v3 = vld [vmem:[#allocation46_spill] sm:$0xff] }
 0x2e1   : > { %1099 = vset.pattern.permute.xlu2 %v1741_v27 }
 0x2e3   : > { %v684_v63 = vpop.permute.xlu2 %683 }
 0x2e4   : > { %v808_v21 = vmul.f32 %v684_v63, %v2064_v20  ;;  %v809_v4 = vmul.f32 %v684_v63, %v2065_v2 }
 0x2e6   : > { %872 = vst [vmem:[%s1770_s7 + $0x100] sm:$0xff] %v808_v21 }
 0x2e7   : > { %873 = vst [vmem:[%s1770_s7 + $0x108] sm:$0xff] %v809_v4 }
 0x2e9   : > { %774 = vperm.xlu2 %1099, %v1760_v57   ;;  %v2070_v57 = vld [vmem:[#allocation27_spill] sm:$0xff] }
 0x2ea   : > { %v690_v13 = vpop.permute.xlu1 %689 }
 0x2eb   : > { %v810_v24 = vmul.f32 %v690_v13, %v2066_v14  ;;  %v811_v22 = vmul.f32 %v690_v13, %v2067_v8 }
 0x2ed   : > { %874 = vst [vmem:[%s1770_s7 + $0x110] sm:$0xff] %v810_v24 }
 0x2ee   : > { %875 = vst [vmem:[%s1770_s7 + $0x118] sm:$0xff] %v811_v22 }
 0x2f3   : > { %v702_v27 = vpop.permute.xlu2 %701 }
 0x2f4   : > { %v814_v37 = vmul.f32 %v702_v27, %v2068_v36  ;;  %v815_v48 = vmul.f32 %v702_v27, %v2069_v47 }
 0x2f6   : > { %878 = vst [vmem:[%s1770_s7 + $0x130] sm:$0xff] %v814_v37 }
 0x2f7   : > { %879 = vst [vmem:[%s1770_s7 + $0x138] sm:$0xff] %v815_v48 }
 0x2fa   : > { %v708_v0 = vpop.permute.xlu1 %707 }
 0x2fb   : > { %v816_v1 = vmul.f32 %v708_v0, %v2070_v57  ;;  %v817_v55 = vmul.f32 %v708_v0, %v2071_v51 }
 0x2fd   : > { %880 = vst [vmem:[%s1770_s7 + $0x140] sm:$0xff] %v816_v1 }
 0x2fe   : > { %881 = vst [vmem:[%s1770_s7 + $0x148] sm:$0xff] %v817_v55 }
 0x303   : > { %v714_v34 = vpop.permute.xlu2 %713 }
 0x304   : > { %v818_v16 = vmul.f32 %v714_v34, %v2072_v15  ;;  %v819_v33 = vmul.f32 %v714_v34, %v2073_v26 }
 0x306   : > { %882 = vst [vmem:[%s1770_s7 + $0x150] sm:$0xff] %v818_v16 }
 0x307   : > { %883 = vst [vmem:[%s1770_s7 + $0x158] sm:$0xff] %v819_v33 }
 0x30a   : > { %v720_v58 = vpop.permute.xlu1 %719 }
 0x30b   : > { %v820_v61 = vmul.f32 %v720_v58, %v2074_v59  ;;  %v821_v38 = vmul.f32 %v720_v58, %v2075_v7 }
 0x30d   : > { %884 = vst [vmem:[%s1770_s7 + $0x160] sm:$0xff] %v820_v61 }
 0x30e   : > { %885 = vst [vmem:[%s1770_s7 + $0x168] sm:$0xff] %v821_v38 }
 0x313   : > { %v733_v35 = vpop.permute.xlu2 %732 }
 0x314   : > { %v824_v60 = vmul.f32 %v733_v35, %v2076_v29  ;;  %v825_v10 = vmul.f32 %v733_v35, %v2077_v9 }
 0x316   : > { %888 = vst [vmem:[%s1770_s7 + $0x180] sm:$0xff] %v824_v60 }
 0x317   : > { %889 = vst [vmem:[%s1770_s7 + $0x188] sm:$0xff] %v825_v10 }
 0x31a   : > { %v739_v52 = vpop.permute.xlu1 %738 }
 0x31b   : > { %v826_v49 = vmul.f32 %v739_v52, %v2078_v11  ;;  %v827_v56 = vmul.f32 %v739_v52, %v2079_v44 }
 0x31d   : > { %890 = vst [vmem:[%s1770_s7 + $0x190] sm:$0xff] %v826_v49 }
 0x31e   : > { %891 = vst [vmem:[%s1770_s7 + $0x198] sm:$0xff] %v827_v56 }
 0x323   : > { %v745_v31 = vpop.permute.xlu2 %744 }
 0x324   : > { %v828_v53 = vmul.f32 %v745_v31, %v2080_v32  ;;  %v829_v46 = vmul.f32 %v745_v31, %v2081_v19 }
 0x326   : > { %892 = vst [vmem:[%s1770_s7 + $0x1a0] sm:$0xff] %v828_v53 }
 0x327   : > { %893 = vst [vmem:[%s1770_s7 + $0x1a8] sm:$0xff] %v829_v46 }
 0x32a   : > { %v751_v18 = vpop.permute.xlu1 %750 }
 0x32b   : > { %v830_v39 = vmul.f32 %v751_v18, %v2082_v41  ;;  %v831_v62 = vmul.f32 %v751_v18, %v2083_v54 }
 0x32d   : > { %894 = vst [vmem:[%s1770_s7 + $0x1b0] sm:$0xff] %v830_v39 }
 0x32e   : > { %895 = vst [vmem:[%s1770_s7 + $0x1b8] sm:$0xff] %v831_v62 }
 0x333   : > { %v763_v12 = vpop.permute.xlu2 %762 }
 0x334   : > { %v834_v50 = vmul.f32 %v763_v12, %v2084_v30  ;;  %v835_v42 = vmul.f32 %v763_v12, %v2085_v25 }
 0x336   : > { %898 = vst [vmem:[%s1770_s7 + $0x1d0] sm:$0xff] %v834_v50 }
 0x337   : > { %899 = vst [vmem:[%s1770_s7 + $0x1d8] sm:$0xff] %v835_v42 }
 0x33a   : > { %v769_v23 = vpop.permute.xlu1 %768 }
 0x33b   : > { %v836_v6 = vmul.f32 %v769_v23, %v2086_v5  ;;  %v837_v43 = vmul.f32 %v769_v23, %v2087_v45 }
 0x33d   : > { %900 = vst [vmem:[%s1770_s7 + $0x1e0] sm:$0xff] %v836_v6 }
 0x33e   : > { %901 = vst [vmem:[%s1770_s7 + $0x1e8] sm:$0xff] %v837_v43 }
 0x343   : > { %v775_v40 = vpop.permute.xlu2 %774 }
 0x344   : > { %v838_v17 = vmul.f32 %v775_v40, %v2088_v28  ;;  %v839_v63 = vmul.f32 %v775_v40, %v2089_v3 }
 0x346   : > { %902 = vst [vmem:[%s1770_s7 + $0x1f0] sm:$0xff] %v838_v17 }
 0x347   : > { %903 = vst [vmem:[%s1770_s7 + $0x1f8] sm:$0xff] %v839_v63 }
 0x348   : > { %1162 = shalt.err (!%p1159_p4)
}
 0x349   : > { %s1205_s29 = smov 256   ;;  %s1206_s6 = smov 16  }
 0x34a   : > { %1020 = dma.vmem_to_hbm [thread:$0]  (%p1277_p11), %s919_s11, 8192, %s921_s17, %s905_s19, %s1205_s29, %s1205_s29, %s1206_s6  }
 0x34b PF: > { %s935_s23 = sand.u32 1, %s1189_s12   ;;  %p2090_p7 = scmp.ge.s32.totalorder %s1201_s15, 2 }
 0x34c   : > { %s936_s5 = scalar_lea.sflag [#allocation4], %s935_s23 }
 0x34d   : > { %p1027_p5 = pnand %p2090_p7, %p1281_p12 }
 0x34f   : > { %p1028_p8 = pneg %p1027_p5 }
 0x351   : > { %1184 = dma.done.wait (%p1028_p8), %s936_s5, 8192  }
 0x352   : > { %1186 = vsyncadd (%p1028_p8), %s936_s5, 4294959104  ;;  %p16_p10 = scmp.ge.s32.totalorder %s1252_s18, 4   ;;  %s2091_s12 = smov %s1193_s13 }
 0x353   : > { %s2092_s13 = smov %s1197_s14  ;;  %s2093_s14 = smov %s1264_s21 }
 0x354   : > { %s2094_s15 = smov %s1252_s18  ;;  %18 = sbr.rel (!%p16_p10) target bundleno = 5 (0x5), region = 77 }
 0x359   :  { %942 = vsyncpa [#allocation3], 1 }
 0x35a   :  { %944 = vsyncpa [#allocation3 + $0x1], 1 }
 0x35b   :  { %945 = vsyncpa [#allocation4], 1 }
 0x35c   :  { %947 = vsyncpa [#allocation4 + $0x1], 1 }

</bundles_post_ra>
